<compile_context>
chip_gen: v6e
topology: v6e:2x2x1
jax: 0.10.0
libtpu: 0.0.40
codegen_flags: <defaults>
</compile_context>

<pallas_src>
import jax
import jax.numpy as jnp
import numpy as np
from jax import lax
from jax.experimental import pallas as pl
from jax.experimental.pallas import tpu as pltpu

EPS = 1e-5  # PyTorch InstanceNorm2d default eps


# -----------------------------------------------------------------------------
# Pallas kernel: batch-fused DoubleConvUpInstAda body, lane-flattened (B*H, W*C)
#   conv1(3x3,pad1) -> AdaIN (inst-norm + (1+gamma)*x+beta) -> ReLU
#   -> conv2(3x3,pad1) -> InstanceNorm2d -> ReLU
# Conv biases are omitted: a per-channel constant shifts only the per-instance
# mean, which the following normalisation subtracts, so the output is identical.
# -----------------------------------------------------------------------------
def _make_double_conv_kernel(same_pool):
    def kernel(x3_ref, w1_ref, w2_ref, gb_ref, p1_ref, p1t_ref, *rest):
        # x3_ref : (B*H, 3*W*Cin)  bf16  dy-im2col'd, lane-flattened concat input
        # w1_ref : (3*W*Cin, W*Cmid) bf16  banded conv1 weight (dx taps + x-pad folded)
        # w2_ref : (3*W*Cmid, W*Cout) bf16 banded conv2 weight
        # gb_ref : (B, 2*Cmid) f32   AdaIN [gamma | beta] per batch element
        # p1_ref : (W*Cmid, Cmid) f32  lane -> channel pooling
        # p1t_ref: (Cmid, W*Cmid) f32  channel -> lane broadcast
        # rest   : [p2_ref, p2t_ref,] o_ref
        if same_pool:
            (o_ref,) = rest
            p2_ref, p2t_ref = p1_ref, p1t_ref
        else:
            p2_ref, p2t_ref, o_ref = rest

        BH = x3_ref.shape[0]
        B = gb_ref.shape[0]
        H = BH // B
        WCm = w1_ref.shape[1]
        Cmid = p1_ref.shape[1]
        W = WCm // Cmid
        inv_hw = 1.0 / float(H * W)

        gb = gb_ref[...]

        # ---- conv1: one batch-fused, dy-im2col'd bf16 matmul (f32 accumulate) ----
        acc1 = jnp.dot(x3_ref[...], w1_ref[...],
                       preferred_element_type=jnp.float32)        # (BH, W*Cmid) f32

        # ---- AdaIN stats: per-batch row sums + sums-of-squares, one pooling matmul
        sums = []
        for b in range(B):
            ab = acc1[b * H:(b + 1) * H, :]
            sums.append(jnp.sum(ab, axis=0, keepdims=True))
        for b in range(B):
            ab = acc1[b * H:(b + 1) * H, :]
            sums.append(jnp.sum(ab * ab, axis=0, keepdims=True))
        st = jnp.concatenate(sums, axis=0)                         # (2B, W*Cmid)
        cs = jnp.dot(st, p1_ref[...], preferred_element_type=jnp.float32)  # (2B, Cmid)
        mean = cs[:B] * inv_hw                                     # (B, Cmid)
        var = jnp.maximum(cs[B:] * inv_hw - mean * mean, 0.0)      # biased variance
        rstd = lax.rsqrt(var + EPS)
        g1 = 1.0 + gb[:, :Cmid]
        beta = gb[:, Cmid:]
        scale_c = g1 * rstd                                        # (B, Cmid)
        shift_c = beta - scale_c * mean
        ssl = jnp.dot(jnp.concatenate([scale_c, shift_c], axis=0), p1t_ref[...],
                      preferred_element_type=jnp.float32)          # (2B, W*Cmid)

        # ---- apply AdaIN + ReLU and build conv2's dy-im2col in registers ----
        zrow = jnp.zeros((1, WCm), jnp.float32)
        y3_rows = []
        for b in range(B):
            ab = acc1[b * H:(b + 1) * H, :]
            yb = jnp.maximum(ab * ssl[b:b + 1, :] + ssl[B + b:B + b + 1, :], 0.0)
            t0 = jnp.concatenate([zrow, yb[:H - 1, :]], axis=0)    # y[h-1], 0 at h=0
            t2 = jnp.concatenate([yb[1:, :], zrow], axis=0)        # y[h+1], 0 at h=H-1
            y3_rows.append(jnp.concatenate([t0, yb, t2], axis=1))  # (H, 3*W*Cmid)
        y3 = jnp.concatenate(y3_rows, axis=0).astype(jnp.bfloat16)  # (BH, 3*W*Cmid)

        # ---- conv2: one batch-fused bf16 matmul ----
        acc2 = jnp.dot(y3, w2_ref[...],
                       preferred_element_type=jnp.float32)         # (BH, W*Cout)

        # ---- InstanceNorm2d (no affine) + ReLU ----
        sums2 = []
        for b in range(B):
            ab = acc2[b * H:(b + 1) * H, :]
            sums2.append(jnp.sum(ab, axis=0, keepdims=True))
        for b in range(B):
            ab = acc2[b * H:(b + 1) * H, :]
            sums2.append(jnp.sum(ab * ab, axis=0, keepdims=True))
        cs2 = jnp.dot(jnp.concatenate(sums2, axis=0), p2_ref[...],
                      preferred_element_type=jnp.float32)          # (2B, Cout)
        mean2 = cs2[:B] * inv_hw
        var2 = jnp.maximum(cs2[B:] * inv_hw - mean2 * mean2, 0.0)
        rstd2 = lax.rsqrt(var2 + EPS)
        ssl2 = jnp.dot(jnp.concatenate([rstd2, -mean2 * rstd2], axis=0), p2t_ref[...],
                       preferred_element_type=jnp.float32)         # (2B, W*Cout)

        z_rows = []
        for b in range(B):
            ab = acc2[b * H:(b + 1) * H, :]
            z_rows.append(jnp.maximum(ab * ssl2[b:b + 1, :]
                                      + ssl2[B + b:B + b + 1, :], 0.0))
        o_ref[...] = jnp.concatenate(z_rows, axis=0).astype(o_ref.dtype)

    return kernel


# -----------------------------------------------------------------------------
# Wrapper-side constant builders (constant-fold under jax.jit)
# -----------------------------------------------------------------------------
def _shift_onehot(W, kw=3):
    """m[dx, src, w] = 1 iff src == w + dx - 1 and 0 <= src < W (x-pad folded in)."""
    m = np.zeros((kw, W, W), np.float32)
    for dx in range(kw):
        for w in range(W):
            src = w + dx - 1
            if 0 <= src < W:
                m[dx, src, w] = 1.0
    return m


def _banded_conv_weight(w_hwio, W):
    """(3,3,Ci,Co) HWIO -> (3*W*Ci, W*Co) block-banded matmul weight (dy-major rows)."""
    kh, kw, Ci, Co = w_hwio.shape
    m = jnp.asarray(_shift_onehot(W, kw))
    big = jnp.einsum('xsw,yxio->ysiwo', m, w_hwio.astype(jnp.float32))
    return big.reshape(kh * W * Ci, W * Co)


def _pool_mats(W, C):
    """p[(w*C + c), c'] = delta(c, c')  and its transpose (broadcast matrix)."""
    p = np.tile(np.eye(C, dtype=np.float32), (W, 1))
    return jnp.asarray(p), jnp.asarray(p.T)


# -----------------------------------------------------------------------------
# Pallas wrapper for DoubleConvUpInstAda (input: NHWC concat tensor)
# -----------------------------------------------------------------------------
def double_conv_pallas(x_nhwc, s, params):
    w1, w2, wfc, bfc = params["w1"], params["w2"], params["wfc"], params["bfc"]
    B, H, W, Cin = x_nhwc.shape
    Cmid = w1.shape[3]
    Cout = w2.shape[3]
    BH = B * H

    # AdaIN style projection: Linear(style_dim -> 2*Cmid)  (tiny XLA glue)
    gb = (s @ wfc.T + bfc).astype(jnp.float32)                       # (B, 2*Cmid)

    # Lane-flatten (W, C) -> W*C (w-major, c-minor) and dy-im2col in the wrapper.
    xf = x_nhwc.reshape(B, H, W * Cin).astype(jnp.float32)
    xp = jnp.pad(xf, ((0, 0), (1, 1), (0, 0)))                       # (B, H+2, W*Cin)
    x3 = jnp.concatenate([xp[:, 0:H], xp[:, 1:H + 1], xp[:, 2:H + 2]], axis=-1)
    x3 = x3.reshape(BH, 3 * W * Cin).astype(jnp.bfloat16)            # (BH, 3*W*Cin)

    # Banded weights (dx taps + x-pad folded in), bf16 for the MXU.
    w1r = _banded_conv_weight(w1, W).astype(jnp.bfloat16)            # (3*W*Cin,  W*Cmid)
    w2r = _banded_conv_weight(w2, W).astype(jnp.bfloat16)            # (3*W*Cmid, W*Cout)
    p1, p1t = _pool_mats(W, Cmid)
    same_pool = (Cmid == Cout)

    ops = [x3, w1r, w2r, gb, p1, p1t]
    in_specs = [
        pl.BlockSpec((BH, 3 * W * Cin), lambda i: (0, 0)),
        pl.BlockSpec((3 * W * Cin, W * Cmid), lambda i: (0, 0)),
        pl.BlockSpec((3 * W * Cmid, W * Cout), lambda i: (0, 0)),
        pl.BlockSpec((B, 2 * Cmid), lambda i: (0, 0)),
        pl.BlockSpec((W * Cmid, Cmid), lambda i: (0, 0)),
        pl.BlockSpec((Cmid, W * Cmid), lambda i: (0, 0)),
    ]
    if not same_pool:
        p2, p2t = _pool_mats(W, Cout)
        ops += [p2, p2t]
        in_specs += [pl.BlockSpec((W * Cout, Cout), lambda i: (0, 0)),
                     pl.BlockSpec((Cout, W * Cout), lambda i: (0, 0))]

    flops = (2 * BH * (3 * W * Cin) * (W * Cmid)
             + 2 * BH * (3 * W * Cmid) * (W * Cout))
    bytes_accessed = (sum(int(a.size) * a.dtype.itemsize for a in ops)
                      + BH * W * Cout * 4)
    cost = pl.CostEstimate(flops=flops,
                           transcendentals=B * (Cmid + Cout),
                           bytes_accessed=bytes_accessed)

    out = pl.pallas_call(
        _make_double_conv_kernel(same_pool),
        out_shape=jax.ShapeDtypeStruct((BH, W * Cout), jnp.float32),
        grid_spec=pltpu.PrefetchScalarGridSpec(
            num_scalar_prefetch=0,
            grid=(1,),                     # batch fused into the matmul M dimension
            in_specs=in_specs,
            out_specs=pl.BlockSpec((BH, W * Cout), lambda i: (0, 0)),
        ),
        compiler_params=pltpu.CompilerParams(
            dimension_semantics=("arbitrary",)),
        cost_estimate=cost,
    )(*ops)

    return out.reshape(B, H, W, Cout)


# -----------------------------------------------------------------------------
# UpInstAda forward (bilinear=True branch: nearest upsample x2)
# Public interface takes NCHW (PyTorch convention).
# -----------------------------------------------------------------------------
def _upsample_pad_concat_nhwc(x1_nchw, x2_nchw):
    # TODO(synk): upsample/pad/concat + NCHW<->NHWC transposes stay as XLA glue
    # (tiny tensors, pure layout prep) rather than being fused into the kernel.
    x1 = jnp.transpose(x1_nchw, (0, 2, 3, 1))   # NHWC
    x2 = jnp.transpose(x2_nchw, (0, 2, 3, 1))
    # nn.Upsample(scale_factor=2, mode='nearest')
    x1 = jnp.repeat(jnp.repeat(x1, 2, axis=1), 2, axis=2)
    diffY = x2.shape[1] - x1.shape[1]
    diffX = x2.shape[2] - x1.shape[2]
    x1 = jnp.pad(x1, ((0, 0),
                      (diffY // 2, diffY - diffY // 2),
                      (diffX // 2, diffX - diffX // 2),
                      (0, 0)))
    # torch.cat([x2, x1], dim=1)  -> channel concat, x2 first
    return jnp.concatenate([x2, x1], axis=-1)


@jax.jit
def up_inst_ada_forward(x1_nchw, x2_nchw, s, params):
    x = _upsample_pad_concat_nhwc(x1_nchw, x2_nchw)
    out_nhwc = double_conv_pallas(x, s, params)
    return jnp.transpose(out_nhwc, (0, 3, 1, 2)).astype(x2_nchw.dtype)  # NCHW


# -----------------------------------------------------------------------------
# Pure-JAX reference (for correctness check; keeps the conv biases explicitly)
# -----------------------------------------------------------------------------
def up_inst_ada_reference(x1_nchw, x2_nchw, s, params):
    w1, b1, w2, b2, wfc, bfc = (params["w1"], params["b1"], params["w2"],
                                params["b2"], params["wfc"], params["bfc"])
    Cmid = w1.shape[3]
    x = _upsample_pad_concat_nhwc(x1_nchw, x2_nchw)
    dn = ("NHWC", "HWIO", "NHWC")

    y = lax.conv_general_dilated(x, w1, (1, 1), [(1, 1), (1, 1)],
                                 dimension_numbers=dn) + b1
    mu = jnp.mean(y, axis=(1, 2), keepdims=True)
    var = jnp.mean((y - mu) ** 2, axis=(1, 2), keepdims=True)
    yhat = (y - mu) / jnp.sqrt(var + EPS)
    h = s @ wfc.T + bfc
    gamma = h[:, :Cmid][:, None, None, :]
    beta = h[:, Cmid:][:, None, None, :]
    y = jnp.maximum((1.0 + gamma) * yhat + beta, 0.0)

    z = lax.conv_general_dilated(y, w2, (1, 1), [(1, 1), (1, 1)],
                                 dimension_numbers=dn) + b2
    mu2 = jnp.mean(z, axis=(1, 2), keepdims=True)
    var2 = jnp.mean((z - mu2) ** 2, axis=(1, 2), keepdims=True)
    z = jnp.maximum((z - mu2) / jnp.sqrt(var2 + EPS), 0.0)
    return jnp.transpose(z, (0, 3, 1, 2))


# -----------------------------------------------------------------------------
if __name__ == "__main__":
    # UpInstAda(in_channels=16, out_channels=8, bilinear=True, style_dim=32)
    #   -> DoubleConvUpInstAda(16, 8, mid_channels=8, style_dim=32)
    B = 2
    in_channels = 16
    out_channels = 8
    mid_channels = in_channels // 2   # 8
    style_dim = 32
    H2, W2 = 16, 16                   # x2 spatial; x1 is (H2//2, W2//2) pre-upsample

    key = jax.random.PRNGKey(0)
    k = jax.random.split(key, 9)

    params = {
        # conv1: Conv2d(in_channels, mid_channels, 3, padding=1)  -> HWIO
        "w1": jax.random.normal(k[0], (3, 3, in_channels, mid_channels), jnp.float32) * 0.1,
        "b1": jax.random.normal(k[1], (mid_channels,), jnp.float32) * 0.1,
        # conv2: Conv2d(mid_channels, out_channels, 3, padding=1) -> HWIO
        "w2": jax.random.normal(k[2], (3, 3, mid_channels, out_channels), jnp.float32) * 0.1,
        "b2": jax.random.normal(k[3], (out_channels,), jnp.float32) * 0.1,
        # AdaIN fc: Linear(style_dim, 2*mid_channels)
        "wfc": jax.random.normal(k[4], (2 * mid_channels, style_dim), jnp.float32) * 0.1,
        "bfc": jax.random.normal(k[5], (2 * mid_channels,), jnp.float32) * 0.1,
    }
    # NOTE: the `bottle` 1x1 conv in DoubleConvUpInstAda is constructed but never
    # used in forward(), so it is intentionally omitted.  The conv biases are kept
    # in `params` (used by the reference) but are mathematically cancelled by the
    # instance normalisations, so the kernel does not consume them.

    # Inputs (NCHW, PyTorch convention): cat channels = 8 (x2) + 8 (x1) = in_channels
    x1 = jax.random.normal(k[6], (B, in_channels // 2, H2 // 2, W2 // 2), jnp.float32)
    x2 = jax.random.normal(k[7], (B, in_channels // 2, H2, W2), jnp.float32)
    s = jax.random.normal(k[8], (B, style_dim), jnp.float32)

    out = jax.block_until_ready(up_inst_ada_forward(x1, x2, s, params))
    ref = jax.block_until_ready(up_inst_ada_reference(x1, x2, s, params))

    assert out.shape == (B, out_channels, H2, W2), out.shape
    # Tolerance accounts for bf16 MXU operands (stats/normalisation stay f32).
    if not jnp.allclose(out, ref, atol=5e-2, rtol=5e-2):
        max_err = float(jnp.max(jnp.abs(out - ref)))
        raise AssertionError(f"Pallas kernel mismatch vs reference, max_err={max_err}")

    print("KERNEL_OK")
</pallas_src>

<mosaic_0001>
module attributes {stable_mosaic.version = 11 : i64} {
  func.func @kernel(%arg0: i32, %arg1: memref<32x768xbf16, #tpu.memory_space<vmem>>, %arg2: memref<768x128xbf16, #tpu.memory_space<vmem>>, %arg3: memref<384x128xbf16, #tpu.memory_space<vmem>>, %arg4: memref<2x16xf32, #tpu.memory_space<vmem>>, %arg5: memref<128x8xf32, #tpu.memory_space<vmem>>, %arg6: memref<8x128xf32, #tpu.memory_space<vmem>>, %arg7: memref<32x128xf32, #tpu.memory_space<vmem>>) attributes {dimension_semantics = [#tpu.dimension_semantics<arbitrary>], iteration_bounds = array<i64: 1>, scalar_prefetch = 0 : i64, scratch_operands = 0 : i64, tpu.core_type = #tpu.core_type<tc>, window_params = [{pipeline_mode = #tpu.pipeline_mode<synchronous>, transform_indices = @transform_0, window_bounds = array<i64: 32, 768>}, {pipeline_mode = #tpu.pipeline_mode<synchronous>, transform_indices = @transform_1, window_bounds = array<i64: 768, 128>}, {pipeline_mode = #tpu.pipeline_mode<synchronous>, transform_indices = @transform_2, window_bounds = array<i64: 384, 128>}, {pipeline_mode = #tpu.pipeline_mode<synchronous>, transform_indices = @transform_3, window_bounds = array<i64: 2, 16>}, {pipeline_mode = #tpu.pipeline_mode<synchronous>, transform_indices = @transform_4, window_bounds = array<i64: 128, 8>}, {pipeline_mode = #tpu.pipeline_mode<synchronous>, transform_indices = @transform_5, window_bounds = array<i64: 8, 128>}, {pipeline_mode = #tpu.pipeline_mode<synchronous>, transform_indices = @transform_6, window_bounds = array<i64: 32, 128>}]} {
    %c0 = arith.constant 0 : index
    %c0_0 = arith.constant 0 : index
    %0 = vector.load %arg4[%c0, %c0_0] : memref<2x16xf32, #tpu.memory_space<vmem>>, vector<2x16xf32>
    %c0_1 = arith.constant 0 : index
    %c0_2 = arith.constant 0 : index
    %1 = vector.load %arg1[%c0_1, %c0_2] : memref<32x768xbf16, #tpu.memory_space<vmem>>, vector<32x768xbf16>
    %c0_3 = arith.constant 0 : index
    %c0_4 = arith.constant 0 : index
    %2 = vector.load %arg2[%c0_3, %c0_4] : memref<768x128xbf16, #tpu.memory_space<vmem>>, vector<768x128xbf16>
    %cst = arith.constant dense<0.000000e+00> : vector<32x128xf32>
    %3 = tpu.matmul %1, %2, %cst {dimension_numbers = #tpu.dot_dimension_numbers<[1], [0], [0], [1], [0, 0, 1, 1], [], []>} : vector<32x768xbf16>, vector<768x128xbf16>, vector<32x128xf32> -> vector<32x128xf32>
    %4 = vector.extract_strided_slice %3 {offsets = [0, 0], sizes = [16, 128], strides = [1, 1]} : vector<32x128xf32> to vector<16x128xf32>
    %cst_5 = arith.constant dense<0.000000e+00> : vector<128xf32>
    %5 = vector.multi_reduction <add>, %4, %cst_5 [0] : vector<16x128xf32> to vector<128xf32>
    %6 = vector.shape_cast %5 : vector<128xf32> to vector<1x128xf32>
    %7 = vector.extract_strided_slice %3 {offsets = [16, 0], sizes = [16, 128], strides = [1, 1]} : vector<32x128xf32> to vector<16x128xf32>
    %cst_6 = arith.constant dense<0.000000e+00> : vector<128xf32>
    %8 = vector.multi_reduction <add>, %7, %cst_6 [0] : vector<16x128xf32> to vector<128xf32>
    %9 = vector.shape_cast %8 : vector<128xf32> to vector<1x128xf32>
    %10 = vector.extract_strided_slice %3 {offsets = [0, 0], sizes = [16, 128], strides = [1, 1]} : vector<32x128xf32> to vector<16x128xf32>
    %11 = arith.mulf %10, %10 : vector<16x128xf32>
    %cst_7 = arith.constant dense<0.000000e+00> : vector<128xf32>
    %12 = vector.multi_reduction <add>, %11, %cst_7 [0] : vector<16x128xf32> to vector<128xf32>
    %13 = vector.shape_cast %12 : vector<128xf32> to vector<1x128xf32>
    %14 = vector.extract_strided_slice %3 {offsets = [16, 0], sizes = [16, 128], strides = [1, 1]} : vector<32x128xf32> to vector<16x128xf32>
    %15 = arith.mulf %14, %14 : vector<16x128xf32>
    %cst_8 = arith.constant dense<0.000000e+00> : vector<128xf32>
    %16 = vector.multi_reduction <add>, %15, %cst_8 [0] : vector<16x128xf32> to vector<128xf32>
    %17 = vector.shape_cast %16 : vector<128xf32> to vector<1x128xf32>
    %18 = tpu.concatenate %6, %9, %13, %17 in 0 : vector<1x128xf32>, vector<1x128xf32>, vector<1x128xf32>, vector<1x128xf32> -> vector<4x128xf32>
    %c0_9 = arith.constant 0 : index
    %c0_10 = arith.constant 0 : index
    %19 = vector.load %arg5[%c0_9, %c0_10] : memref<128x8xf32, #tpu.memory_space<vmem>>, vector<128x8xf32>
    %cst_11 = arith.constant dense<0.000000e+00> : vector<4x8xf32>
    %20 = tpu.matmul %18, %19, %cst_11 {dimension_numbers = #tpu.dot_dimension_numbers<[1], [0], [0], [1], [0, 0, 1, 1], [], []>} : vector<4x128xf32>, vector<128x8xf32>, vector<4x8xf32> -> vector<4x8xf32>
    %21 = vector.extract_strided_slice %20 {offsets = [0, 0], sizes = [2, 8], strides = [1, 1]} : vector<4x8xf32> to vector<2x8xf32>
    %cst_12 = arith.constant 3.906250e-03 : f32
    %22 = vector.broadcast %cst_12 : f32 to vector<2x8xf32>
    %23 = arith.mulf %21, %22 : vector<2x8xf32>
    %24 = vector.extract_strided_slice %20 {offsets = [2, 0], sizes = [2, 8], strides = [1, 1]} : vector<4x8xf32> to vector<2x8xf32>
    %cst_13 = arith.constant 3.906250e-03 : f32
    %25 = vector.broadcast %cst_13 : f32 to vector<2x8xf32>
    %26 = arith.mulf %24, %25 : vector<2x8xf32>
    %27 = arith.mulf %23, %23 : vector<2x8xf32>
    %28 = arith.subf %26, %27 : vector<2x8xf32>
    %cst_14 = arith.constant 0.000000e+00 : f32
    %29 = vector.broadcast %cst_14 : f32 to vector<2x8xf32>
    %30 = arith.maximumf %28, %29 : vector<2x8xf32>
    %cst_15 = arith.constant 9.99999974E-6 : f32
    %31 = vector.broadcast %cst_15 : f32 to vector<2x8xf32>
    %32 = arith.addf %30, %31 : vector<2x8xf32>
    %33 = math.rsqrt %32 : vector<2x8xf32>
    %34 = vector.extract_strided_slice %0 {offsets = [0, 0], sizes = [2, 8], strides = [1, 1]} : vector<2x16xf32> to vector<2x8xf32>
    %cst_16 = arith.constant 1.000000e+00 : f32
    %35 = vector.broadcast %cst_16 : f32 to vector<2x8xf32>
    %36 = arith.addf %35, %34 : vector<2x8xf32>
    %37 = vector.extract_strided_slice %0 {offsets = [0, 8], sizes = [2, 8], strides = [1, 1]} : vector<2x16xf32> to vector<2x8xf32>
    %38 = arith.mulf %36, %33 : vector<2x8xf32>
    %39 = arith.mulf %38, %23 : vector<2x8xf32>
    %40 = arith.subf %37, %39 : vector<2x8xf32>
    %41 = tpu.concatenate %38, %40 in 0 : vector<2x8xf32>, vector<2x8xf32> -> vector<4x8xf32>
    %c0_17 = arith.constant 0 : index
    %c0_18 = arith.constant 0 : index
    %42 = vector.load %arg6[%c0_17, %c0_18] : memref<8x128xf32, #tpu.memory_space<vmem>>, vector<8x128xf32>
    %cst_19 = arith.constant dense<0.000000e+00> : vector<4x128xf32>
    %43 = tpu.matmul %41, %42, %cst_19 {dimension_numbers = #tpu.dot_dimension_numbers<[1], [0], [0], [1], [0, 0, 1, 1], [], []>} : vector<4x8xf32>, vector<8x128xf32>, vector<4x128xf32> -> vector<4x128xf32>
    %cst_20 = arith.constant 0.000000e+00 : f32
    %44 = vector.broadcast %cst_20 : f32 to vector<1x128xf32>
    %45 = vector.extract_strided_slice %3 {offsets = [0, 0], sizes = [16, 128], strides = [1, 1]} : vector<32x128xf32> to vector<16x128xf32>
    %46 = vector.extract_strided_slice %43 {offsets = [0, 0], sizes = [1, 128], strides = [1, 1]} : vector<4x128xf32> to vector<1x128xf32>
    %47 = vector.broadcast %46 : vector<1x128xf32> to vector<16x128xf32>
    %48 = arith.mulf %45, %47 : vector<16x128xf32>
    %49 = vector.extract_strided_slice %43 {offsets = [2, 0], sizes = [1, 128], strides = [1, 1]} : vector<4x128xf32> to vector<1x128xf32>
    %50 = vector.broadcast %49 : vector<1x128xf32> to vector<16x128xf32>
    %51 = arith.addf %48, %50 : vector<16x128xf32>
    %cst_21 = arith.constant 0.000000e+00 : f32
    %52 = vector.broadcast %cst_21 : f32 to vector<16x128xf32>
    %53 = arith.maximumf %51, %52 : vector<16x128xf32>
    %54 = vector.extract_strided_slice %53 {offsets = [0, 0], sizes = [15, 128], strides = [1, 1]} : vector<16x128xf32> to vector<15x128xf32>
    %55 = tpu.concatenate %44, %54 in 0 : vector<1x128xf32>, vector<15x128xf32> -> vector<16x128xf32>
    %56 = vector.extract_strided_slice %53 {offsets = [1, 0], sizes = [15, 128], strides = [1, 1]} : vector<16x128xf32> to vector<15x128xf32>
    %57 = tpu.concatenate %56, %44 in 0 : vector<15x128xf32>, vector<1x128xf32> -> vector<16x128xf32>
    %58 = tpu.concatenate %55, %53, %57 in 1 : vector<16x128xf32>, vector<16x128xf32>, vector<16x128xf32> -> vector<16x384xf32>
    %59 = vector.extract_strided_slice %3 {offsets = [16, 0], sizes = [16, 128], strides = [1, 1]} : vector<32x128xf32> to vector<16x128xf32>
    %60 = vector.extract_strided_slice %43 {offsets = [1, 0], sizes = [1, 128], strides = [1, 1]} : vector<4x128xf32> to vector<1x128xf32>
    %61 = vector.broadcast %60 : vector<1x128xf32> to vector<16x128xf32>
    %62 = arith.mulf %59, %61 : vector<16x128xf32>
    %63 = vector.extract_strided_slice %43 {offsets = [3, 0], sizes = [1, 128], strides = [1, 1]} : vector<4x128xf32> to vector<1x128xf32>
    %64 = vector.broadcast %63 : vector<1x128xf32> to vector<16x128xf32>
    %65 = arith.addf %62, %64 : vector<16x128xf32>
    %cst_22 = arith.constant 0.000000e+00 : f32
    %66 = vector.broadcast %cst_22 : f32 to vector<16x128xf32>
    %67 = arith.maximumf %65, %66 : vector<16x128xf32>
    %68 = vector.extract_strided_slice %67 {offsets = [0, 0], sizes = [15, 128], strides = [1, 1]} : vector<16x128xf32> to vector<15x128xf32>
    %69 = tpu.concatenate %44, %68 in 0 : vector<1x128xf32>, vector<15x128xf32> -> vector<16x128xf32>
    %70 = vector.extract_strided_slice %67 {offsets = [1, 0], sizes = [15, 128], strides = [1, 1]} : vector<16x128xf32> to vector<15x128xf32>
    %71 = tpu.concatenate %70, %44 in 0 : vector<15x128xf32>, vector<1x128xf32> -> vector<16x128xf32>
    %72 = tpu.concatenate %69, %67, %71 in 1 : vector<16x128xf32>, vector<16x128xf32>, vector<16x128xf32> -> vector<16x384xf32>
    %73 = tpu.concatenate %58, %72 in 0 : vector<16x384xf32>, vector<16x384xf32> -> vector<32x384xf32>
    %74 = arith.truncf %73 : vector<32x384xf32> to vector<32x384xbf16>
    %c0_23 = arith.constant 0 : index
    %c0_24 = arith.constant 0 : index
    %75 = vector.load %arg3[%c0_23, %c0_24] : memref<384x128xbf16, #tpu.memory_space<vmem>>, vector<384x128xbf16>
    %cst_25 = arith.constant dense<0.000000e+00> : vector<32x128xf32>
    %76 = tpu.matmul %74, %75, %cst_25 {dimension_numbers = #tpu.dot_dimension_numbers<[1], [0], [0], [1], [0, 0, 1, 1], [], []>} : vector<32x384xbf16>, vector<384x128xbf16>, vector<32x128xf32> -> vector<32x128xf32>
    %77 = vector.extract_strided_slice %76 {offsets = [0, 0], sizes = [16, 128], strides = [1, 1]} : vector<32x128xf32> to vector<16x128xf32>
    %cst_26 = arith.constant dense<0.000000e+00> : vector<128xf32>
    %78 = vector.multi_reduction <add>, %77, %cst_26 [0] : vector<16x128xf32> to vector<128xf32>
    %79 = vector.shape_cast %78 : vector<128xf32> to vector<1x128xf32>
    %80 = vector.extract_strided_slice %76 {offsets = [16, 0], sizes = [16, 128], strides = [1, 1]} : vector<32x128xf32> to vector<16x128xf32>
    %cst_27 = arith.constant dense<0.000000e+00> : vector<128xf32>
    %81 = vector.multi_reduction <add>, %80, %cst_27 [0] : vector<16x128xf32> to vector<128xf32>
    %82 = vector.shape_cast %81 : vector<128xf32> to vector<1x128xf32>
    %83 = vector.extract_strided_slice %76 {offsets = [0, 0], sizes = [16, 128], strides = [1, 1]} : vector<32x128xf32> to vector<16x128xf32>
    %84 = arith.mulf %83, %83 : vector<16x128xf32>
    %cst_28 = arith.constant dense<0.000000e+00> : vector<128xf32>
    %85 = vector.multi_reduction <add>, %84, %cst_28 [0] : vector<16x128xf32> to vector<128xf32>
    %86 = vector.shape_cast %85 : vector<128xf32> to vector<1x128xf32>
    %87 = vector.extract_strided_slice %76 {offsets = [16, 0], sizes = [16, 128], strides = [1, 1]} : vector<32x128xf32> to vector<16x128xf32>
    %88 = arith.mulf %87, %87 : vector<16x128xf32>
    %cst_29 = arith.constant dense<0.000000e+00> : vector<128xf32>
    %89 = vector.multi_reduction <add>, %88, %cst_29 [0] : vector<16x128xf32> to vector<128xf32>
    %90 = vector.shape_cast %89 : vector<128xf32> to vector<1x128xf32>
    %91 = tpu.concatenate %79, %82, %86, %90 in 0 : vector<1x128xf32>, vector<1x128xf32>, vector<1x128xf32>, vector<1x128xf32> -> vector<4x128xf32>
    %c0_30 = arith.constant 0 : index
    %c0_31 = arith.constant 0 : index
    %92 = vector.load %arg5[%c0_30, %c0_31] : memref<128x8xf32, #tpu.memory_space<vmem>>, vector<128x8xf32>
    %cst_32 = arith.constant dense<0.000000e+00> : vector<4x8xf32>
    %93 = tpu.matmul %91, %92, %cst_32 {dimension_numbers = #tpu.dot_dimension_numbers<[1], [0], [0], [1], [0, 0, 1, 1], [], []>} : vector<4x128xf32>, vector<128x8xf32>, vector<4x8xf32> -> vector<4x8xf32>
    %94 = vector.extract_strided_slice %93 {offsets = [0, 0], sizes = [2, 8], strides = [1, 1]} : vector<4x8xf32> to vector<2x8xf32>
    %cst_33 = arith.constant 3.906250e-03 : f32
    %95 = vector.broadcast %cst_33 : f32 to vector<2x8xf32>
    %96 = arith.mulf %94, %95 : vector<2x8xf32>
    %97 = vector.extract_strided_slice %93 {offsets = [2, 0], sizes = [2, 8], strides = [1, 1]} : vector<4x8xf32> to vector<2x8xf32>
    %cst_34 = arith.constant 3.906250e-03 : f32
    %98 = vector.broadcast %cst_34 : f32 to vector<2x8xf32>
    %99 = arith.mulf %97, %98 : vector<2x8xf32>
    %100 = arith.mulf %96, %96 : vector<2x8xf32>
    %101 = arith.subf %99, %100 : vector<2x8xf32>
    %cst_35 = arith.constant 0.000000e+00 : f32
    %102 = vector.broadcast %cst_35 : f32 to vector<2x8xf32>
    %103 = arith.maximumf %101, %102 : vector<2x8xf32>
    %cst_36 = arith.constant 9.99999974E-6 : f32
    %104 = vector.broadcast %cst_36 : f32 to vector<2x8xf32>
    %105 = arith.addf %103, %104 : vector<2x8xf32>
    %106 = math.rsqrt %105 : vector<2x8xf32>
    %cst_37 = arith.constant 0.000000e+00 : f32
    %107 = vector.broadcast %cst_37 : f32 to vector<2x8xf32>
    %108 = arith.subf %107, %96 : vector<2x8xf32>
    %109 = arith.mulf %108, %106 : vector<2x8xf32>
    %110 = tpu.concatenate %106, %109 in 0 : vector<2x8xf32>, vector<2x8xf32> -> vector<4x8xf32>
    %c0_38 = arith.constant 0 : index
    %c0_39 = arith.constant 0 : index
    %111 = vector.load %arg6[%c0_38, %c0_39] : memref<8x128xf32, #tpu.memory_space<vmem>>, vector<8x128xf32>
    %cst_40 = arith.constant dense<0.000000e+00> : vector<4x128xf32>
    %112 = tpu.matmul %110, %111, %cst_40 {dimension_numbers = #tpu.dot_dimension_numbers<[1], [0], [0], [1], [0, 0, 1, 1], [], []>} : vector<4x8xf32>, vector<8x128xf32>, vector<4x128xf32> -> vector<4x128xf32>
    %113 = vector.extract_strided_slice %76 {offsets = [0, 0], sizes = [16, 128], strides = [1, 1]} : vector<32x128xf32> to vector<16x128xf32>
    %114 = vector.extract_strided_slice %112 {offsets = [0, 0], sizes = [1, 128], strides = [1, 1]} : vector<4x128xf32> to vector<1x128xf32>
    %115 = vector.broadcast %114 : vector<1x128xf32> to vector<16x128xf32>
    %116 = arith.mulf %113, %115 : vector<16x128xf32>
    %117 = vector.extract_strided_slice %112 {offsets = [2, 0], sizes = [1, 128], strides = [1, 1]} : vector<4x128xf32> to vector<1x128xf32>
    %118 = vector.broadcast %117 : vector<1x128xf32> to vector<16x128xf32>
    %119 = arith.addf %116, %118 : vector<16x128xf32>
    %cst_41 = arith.constant 0.000000e+00 : f32
    %120 = vector.broadcast %cst_41 : f32 to vector<16x128xf32>
    %121 = arith.maximumf %119, %120 : vector<16x128xf32>
    %122 = vector.extract_strided_slice %76 {offsets = [16, 0], sizes = [16, 128], strides = [1, 1]} : vector<32x128xf32> to vector<16x128xf32>
    %123 = vector.extract_strided_slice %112 {offsets = [1, 0], sizes = [1, 128], strides = [1, 1]} : vector<4x128xf32> to vector<1x128xf32>
    %124 = vector.broadcast %123 : vector<1x128xf32> to vector<16x128xf32>
    %125 = arith.mulf %122, %124 : vector<16x128xf32>
    %126 = vector.extract_strided_slice %112 {offsets = [3, 0], sizes = [1, 128], strides = [1, 1]} : vector<4x128xf32> to vector<1x128xf32>
    %127 = vector.broadcast %126 : vector<1x128xf32> to vector<16x128xf32>
    %128 = arith.addf %125, %127 : vector<16x128xf32>
    %cst_42 = arith.constant 0.000000e+00 : f32
    %129 = vector.broadcast %cst_42 : f32 to vector<16x128xf32>
    %130 = arith.maximumf %128, %129 : vector<16x128xf32>
    %131 = tpu.concatenate %121, %130 in 0 : vector<16x128xf32>, vector<16x128xf32> -> vector<32x128xf32>
    %c0_43 = arith.constant 0 : index
    %c0_44 = arith.constant 0 : index
    %132 = vector.load %arg7[%c0_43, %c0_44] : memref<32x128xf32, #tpu.memory_space<vmem>>, vector<32x128xf32>
    tpu.vector_store %arg7[%c0_43, %c0_44], %131 {strides = array<i32>} : memref<32x128xf32, #tpu.memory_space<vmem>>, vector<32x128xf32>,
    return
  }
  func.func @transform_0(%arg0: i32) -> (i32, i32) {
    %c0_i32 = arith.constant 0 : i32
    %c0_i32_0 = arith.constant 0 : i32
    %c0_i32_1 = arith.constant 0 : i32
    return %c0_i32, %c0_i32_0 : i32, i32
  }
  func.func @transform_1(%arg0: i32) -> (i32, i32) {
    %c0_i32 = arith.constant 0 : i32
    %c0_i32_0 = arith.constant 0 : i32
    %c0_i32_1 = arith.constant 0 : i32
    return %c0_i32, %c0_i32_0 : i32, i32
  }
  func.func @transform_2(%arg0: i32) -> (i32, i32) {
    %c0_i32 = arith.constant 0 : i32
    %c0_i32_0 = arith.constant 0 : i32
    %c0_i32_1 = arith.constant 0 : i32
    return %c0_i32, %c0_i32_0 : i32, i32
  }
  func.func @transform_3(%arg0: i32) -> (i32, i32) {
    %c0_i32 = arith.constant 0 : i32
    %c0_i32_0 = arith.constant 0 : i32
    %c0_i32_1 = arith.constant 0 : i32
    return %c0_i32, %c0_i32_0 : i32, i32
  }
  func.func @transform_4(%arg0: i32) -> (i32, i32) {
    %c0_i32 = arith.constant 0 : i32
    %c0_i32_0 = arith.constant 0 : i32
    %c0_i32_1 = arith.constant 0 : i32
    return %c0_i32, %c0_i32_0 : i32, i32
  }
  func.func @transform_5(%arg0: i32) -> (i32, i32) {
    %c0_i32 = arith.constant 0 : i32
    %c0_i32_0 = arith.constant 0 : i32
    %c0_i32_1 = arith.constant 0 : i32
    return %c0_i32, %c0_i32_0 : i32, i32
  }
  func.func @transform_6(%arg0: i32) -> (i32, i32) {
    %c0_i32 = arith.constant 0 : i32
    %c0_i32_0 = arith.constant 0 : i32
    %c0_i32_1 = arith.constant 0 : i32
    return %c0_i32, %c0_i32_0 : i32, i32
  }
}

</mosaic_0001>

<bundles_post_ra>
// kernel: up_inst_ada_forward.1
= control target key start
LH: loop header
LB: loop body
LE: loop exit
PB: predicated region body
PF: predicated region fallthrough
CT: control target
= control target key end

     0   :  { %v1897_v60 = vmov 0.0   ;;  %vm1898_vm0 = vmmov 0   ;;  %vm660_vm1 = vcmask 1040384   ;;  %vm662_vm2 = vcmask 1041408   ;;  %s1899_s28 = smov 8   ;;  %s1900_s19 = smov 120   ;;  %s2444_s1 = inlined_call_operand.vmem [shape: bf16[768,128], index: 1, kind: input, shape index: {}]   ;;  %s2445_s0 = inlined_call_operand.vmem [shape: bf16[32,768], index: 0, kind: input, shape index: {}]   ;;  %s2446_s4 = inlined_call_operand.vmem [shape: f32[128,8], index: 4, kind: input, shape index: {}]   ;;  %s2447_s3 = inlined_call_operand.vmem [shape: f32[2,16], index: 3, kind: input, shape index: {}]   ;;  %s2448_s5 = inlined_call_operand.vmem [shape: f32[8,128], index: 5, kind: input, shape index: {}]   ;;  %s2449_s2 = inlined_call_operand.vmem [shape: bf16[384,128], index: 2, kind: input, shape index: {}]   ;;  %s2450_s6 = inlined_call_operand.vmem [shape: f32[32,128], index: 6, kind: output, shape index: {}]  }
   0x1   :  { %v1803_v0 = vld [vmem:[%s2444_s1 + $0x78] sm:$0xff]   ;;  %v1807_v4 = vld [vmem:[%s2444_s1 + $0x70] sm:$0xff]   ;;  %v1811_v8 = vld [vmem:[%s2444_s1 + $0x68] sm:$0xff]   ;;  %vm664_vm3 = vcmask 1042432   ;;  %vm779_vm4 = vcmask 64512   ;;  %vm875_vm6 = vcmask 1046528  }
   0x2   :  { %v1804_v1 = vld [vmem:[%s2444_s1 + $0xf8] sm:$0xff]   ;;  %1538 = vmatprep.subr.bf16.mxu0 %v1803_v0  ;;  %v1808_v5 = vld [vmem:[%s2444_s1 + $0xf0] sm:$0xff]   ;;  %v1812_v9 = vld [vmem:[%s2444_s1 + $0xe8] sm:$0xff]   ;;  %vm1901_vm7 = vmmov 1  }
   0x3   :  { %v1805_v2 = vld [vmem:[%s2444_s1 + $0x38] sm:$0xff]   ;;  %1566 = vmatprep.subr.bf16.mxu1 %v1804_v1  ;;  %v1809_v6 = vld [vmem:[%s2444_s1 + $0x30] sm:$0xff]   ;;  %v1813_v10 = vld [vmem:[%s2444_s1 + $0x28] sm:$0xff]  }
   0x4   :  { %v1806_v3 = vld [vmem:[%s2444_s1 + $0xb8] sm:$0xff]   ;;  %1539 = vmatpush3.bf16.msra.mxu0 %v1805_v2  ;;  %v1810_v7 = vld [vmem:[%s2444_s1 + $0xb0] sm:$0xff]   ;;  %v1814_v11 = vld [vmem:[%s2444_s1 + $0xa8] sm:$0xff]  }
   0x5   :  { %1567 = vmatpush3.bf16.msra.mxu1 %v1806_v3  ;;  %1540 = vmatprep.subr.bf16.mxu0 %v1807_v4  ;;  %v1815_v12 = vld [vmem:[%s2444_s1 + $0x60] sm:$0xff]   ;;  %v1819_v16 = vld [vmem:[%s2444_s1 + $0x58] sm:$0xff]   ;;  %v1823_v20 = vld [vmem:[%s2444_s1 + $0x50] sm:$0xff]  }
   0x6   :  { %1568 = vmatprep.subr.bf16.mxu1 %v1808_v5  ;;  %v1816_v13 = vld [vmem:[%s2444_s1 + $0xe0] sm:$0xff]   ;;  %v1820_v17 = vld [vmem:[%s2444_s1 + $0xd8] sm:$0xff]   ;;  %v1824_v21 = vld [vmem:[%s2444_s1 + $0xd0] sm:$0xff]  }
   0x7   :  { %v1817_v14 = vld [vmem:[%s2444_s1 + $0x20] sm:$0xff]   ;;  %v1821_v18 = vld [vmem:[%s2444_s1 + $0x18] sm:$0xff]   ;;  %v1825_v22 = vld [vmem:[%s2444_s1 + $0x10] sm:$0xff]  }
   0x8   :  { %1541 = vmatpush3.bf16.msra.mxu0 %v1809_v6  ;;  %v1818_v15 = vld [vmem:[%s2444_s1 + $0xa0] sm:$0xff]   ;;  %v1822_v19 = vld [vmem:[%s2444_s1 + $0x98] sm:$0xff]   ;;  %v1826_v23 = vld [vmem:[%s2444_s1 + $0x90] sm:$0xff]  }
   0x9   :  { %1569 = vmatpush3.bf16.msra.mxu1 %v1810_v7  ;;  %1542 = vmatprep.subr.bf16.mxu0 %v1811_v8  ;;  %v1827_v24 = vld [vmem:[%s2444_s1 + $0x48] sm:$0xff]   ;;  %v1831_v28 = vld [vmem:[%s2444_s1 + $0x40] sm:$0xff]   ;;  %v1841_v36 = vld [vmem:[%s2444_s1 + $0x178] sm:$0xff]  }
   0xa   :  { %1570 = vmatprep.subr.bf16.mxu1 %v1812_v9  ;;  %v1828_v25 = vld [vmem:[%s2444_s1 + $0xc8] sm:$0xff]   ;;  %v1832_v29 = vld [vmem:[%s2444_s1 + $0xc0] sm:$0xff]   ;;  %v1842_v37 = vld [vmem:[%s2444_s1 + $0x138] sm:$0xff]  }
   0xb   :  { %v1829_v26 = vld [vmem:[%s2444_s1 + $0x8] sm:$0xff]   ;;  %v1833_v30 = vld [vmem:[%s2444_s1] sm:$0xff]   ;;  %v1843_v38 = vld [vmem:[%s2444_s1 + $0x170] sm:$0xff]  }
   0xc   :  { %1543 = vmatpush3.bf16.msra.mxu0 %v1813_v10  ;;  %v1830_v27 = vld [vmem:[%s2444_s1 + $0x88] sm:$0xff]   ;;  %v1834_v31 = vld [vmem:[%s2444_s1 + $0x80] sm:$0xff]   ;;  %v1844_v39 = vld [vmem:[%s2444_s1 + $0x130] sm:$0xff]  }
   0xd   :  { %1571 = vmatpush3.bf16.msra.mxu1 %v1814_v11  ;;  %1544 = vmatprep.subr.bf16.mxu0 %v1815_v12  ;;  %v1835_v32 = vld [vmem:[%s2445_s0] ss:$24 sps:$4 sm:$0xff]   ;;  %v1837_v33 = vld [vmem:[%s2445_s0 + $0x4] ss:$24 sps:$4 sm:$0xff]   ;;  %v1845_v40 = vld [vmem:[%s2444_s1 + $0x168] sm:$0xff]  }
   0xe   :  { %1572 = vmatprep.subr.bf16.mxu1 %v1816_v13  ;;  %v1838_v34 = vld [vmem:[%s2445_s0 + $0x8] ss:$24 sps:$4 sm:$0xff]   ;;  %v1840_v35 = vld [vmem:[%s2445_s0 + $0xc] ss:$24 sps:$4 sm:$0xff]   ;;  %513 = vmatprep.mubr.bf16.mxu0 %v1837_v33  ;;  %v1852_v45 = vld [vmem:[%s2445_s0 + $0x3c] ss:$24 sps:$4 sm:$0xff]  }
   0xf   :  { %562 = vmatprep.mubr.bf16.mxu1 %v1840_v35  ;;  %v1846_v41 = vld [vmem:[%s2444_s1 + $0x128] sm:$0xff]   ;;  %v1847_v42 = vld [vmem:[%s2444_s1 + $0x160] sm:$0xff]   ;;  %v1849_v46 = vld [vmem:[%s2444_s1 + $0x158] sm:$0xff]  }
  0x10   :  { %1545 = vmatpush3.bf16.msra.mxu0 %v1817_v14  ;;  %v1848_v43 = vld [vmem:[%s2444_s1 + $0x120] sm:$0xff]   ;;  %v1850_v44 = vld [vmem:[%s2445_s0 + $0x34] ss:$24 sps:$4 sm:$0xff]   ;;  %v1855_v47 = vld [vmem:[%s2445_s0 + $0x30] ss:$24 sps:$4 sm:$0xff]  }
  0x11   :  { %1573 = vmatpush3.bf16.msra.mxu1 %v1818_v15  ;;  %1546 = vmatprep.subr.bf16.mxu0 %v1819_v16  ;;  %v1856_v48 = vld [vmem:[%s2445_s0 + $0x38] ss:$24 sps:$4 sm:$0xff]   ;;  %v1865_v52 = vld [vmem:[%s2445_s0 + $0x14] ss:$24 sps:$4 sm:$0xff]   ;;  %v1861_v55 = vld [vmem:[%s2444_s1 + $0x140] sm:$0xff]  }
  0x12   :  { %1574 = vmatprep.subr.bf16.mxu1 %v1820_v17  ;;  %v1854_v49 = vld [vmem:[%s2444_s1 + $0x118] sm:$0xff]   ;;  %v1857_v50 = vld [vmem:[%s2444_s1 + $0x150] sm:$0xff]   ;;  %v1859_v53 = vld [vmem:[%s2444_s1 + $0x148] sm:$0xff]  }
  0x13   :  { %v1858_v51 = vld [vmem:[%s2444_s1 + $0x110] sm:$0xff]   ;;  %v1860_v54 = vld [vmem:[%s2444_s1 + $0x108] sm:$0xff]   ;;  %v1862_v56 = vld [vmem:[%s2444_s1 + $0x100] sm:$0xff]  }
  0x14   :  { %1547 = vmatpush3.bf16.msra.mxu0 %v1821_v18  ;;  %v1863_v57 = vld [vmem:[%s2445_s0 + $0x10] ss:$24 sps:$4 sm:$0xff]   ;;  %v1866_v58 = vld [vmem:[%s2445_s0 + $0x44] ss:$24 sps:$4 sm:$0xff]   ;;  %v1868_v59 = vld [vmem:[%s2445_s0 + $0x40] ss:$24 sps:$4 sm:$0xff]  }
  0x15   :  { %1575 = vmatpush3.bf16.msra.mxu1 %v1822_v19  ;;  %1548 = vmatprep.subr.bf16.mxu0 %v1823_v20  ;;  %v2121_v61 = vld [vmem:[%s2446_s4 + $0x78] sm:$0xff]  ;;  %v2128_v62 = vld [vmem:[%s2446_s4 + $0x70] sm:$0xff]  ;;  %v2135_v63 = vld [vmem:[%s2446_s4 + $0x68] sm:$0xff] }
  0x16   :  { %1576 = vmatprep.subr.bf16.mxu1 %v1824_v21  ;;  %v2142_v0 = vld [vmem:[%s2446_s4 + $0x60] sm:$0xff]  ;;  %v2149_v1 = vld [vmem:[%s2446_s4 + $0x58] sm:$0xff]  ;;  %v2156_v2 = vld [vmem:[%s2446_s4 + $0x50] sm:$0xff] }
  0x17   :  { %v2163_v3 = vld [vmem:[%s2446_s4 + $0x48] sm:$0xff]  ;;  %v2170_v4 = vld [vmem:[%s2446_s4 + $0x40] sm:$0xff]  ;;  %v2177_v5 = vld [vmem:[%s2446_s4 + $0x38] sm:$0xff] }
  0x18   :  { %1549 = vmatpush3.bf16.msra.mxu0 %v1825_v22  ;;  %v2184_v6 = vld [vmem:[%s2446_s4 + $0x30] sm:$0xff]  ;;  %v2191_v7 = vld [vmem:[%s2446_s4 + $0x28] sm:$0xff]  ;;  %v2198_v8 = vld [vmem:[%s2446_s4 + $0x20] sm:$0xff] }
  0x19   :  { %1577 = vmatpush3.bf16.msra.mxu1 %v1826_v23  ;;  %1550 = vmatprep.subr.bf16.mxu0 %v1827_v24  ;;  %v2205_v9 = vld [vmem:[%s2446_s4 + $0x18] sm:$0xff]  ;;  %v2212_v10 = vld [vmem:[%s2446_s4 + $0x10] sm:$0xff]  ;;  %v2218_v11 = vld [vmem:[%s2446_s4 + $0x8] sm:$0xff] }
  0x1a   :  { %1578 = vmatprep.subr.bf16.mxu1 %v1828_v25  ;;  %v2224_v12 = vld [vmem:[%s2446_s4] sm:$0xff]  ;;  %vm1523_vm5 = vmneg %vm660_vm1 }
  0x1b   :  { %vm2362_vm8 = vmpackc.low %vm1901_vm7, %vm1523_vm5 }
  0x1c   :  { %1551 = vmatpush3.bf16.msra.mxu0 %v1829_v26  ;;  %vm1531_vm9 = vmpackc.low %vm875_vm6, %vm1901_vm7 }
  0x1d   :  { %1579 = vmatpush3.bf16.msra.mxu1 %v1830_v27  ;;  %1552 = vmatprep.subr.bf16.mxu0 %v1831_v28 }
  0x1e   :  { %1580 = vmatprep.subr.bf16.mxu1 %v1832_v29 }
  0x20   :  { %1553 = vmatpush3.bf16.msra.mxu0 %v1833_v30 }
  0x21   :  { %1581 = vmatpush3.bf16.msra.mxu1 %v1834_v31  ;;  %1594 = vmatprep.subr.bf16.mxu0 %v1841_v36 }
  0x22   :  { %1698 = vmatprep.subr.mxu1 %v1897_v60 }
  0x23   :  { %514 = vmatmul.mubr.bf16.vlgmr.msra.gmra.mxu0 %v1835_v32 }
  0x24   :  { %563 = vmatmul.mubr.bf16.vlgmr.msra.gmra.mxu1 %v1838_v34  ;;  %1595 = vmatpush3.bf16.msra.mxu0 %v1842_v37 }
  0x25   :  { %1596 = vmatprep.subr.bf16.mxu0 %v1843_v38  ;;  %521 = vmatprep.mubr.bf16.mxu0 %v1850_v44 }
  0x26   :  { %570 = vmatprep.mubr.bf16.mxu1 %v1852_v45  ;;  %1699 = vmatpush3.msra.mxu1 %v2121_v61 }
  0x27   :  { %1700 = vmatprep.subr.mxu1 %v1897_v60 }
  0x28   :  { %1597 = vmatpush3.bf16.msra.mxu0 %v1844_v39  ;;  %1701 = vmatpush3.msra.mxu1 %v2128_v62 }
  0x29   :  { %1598 = vmatprep.subr.bf16.mxu0 %v1845_v40  ;;  %1702 = vmatprep.subr.mxu1 %v1897_v60 }
  0x2a   :  { %1703 = vmatpush3.msra.mxu1 %v2135_v63 }
  0x2b   :  { %522 = vmatmul.mubr.bf16.gmra.mxu0 %v1855_v47  ;;  %1704 = vmatprep.subr.mxu1 %v1897_v60 }
  0x2c   :  { %1599 = vmatpush3.bf16.msra.mxu0 %v1846_v41  ;;  %571 = vmatmul.mubr.bf16.gmra.mxu1 %v1856_v48 }
  0x2d   :  { %1600 = vmatprep.subr.bf16.mxu0 %v1847_v42  ;;  %611 = vmatprep.mubr.bf16.mxu0 %v1865_v52 }
  0x2e   :  { %1705 = vmatpush3.msra.mxu1 %v2142_v0  ;;  %1730 = vmatprep.mubr.msk.f32.mxu1 %vm1898_vm0, %v1897_v60 }
  0x2f   :  { %1706 = vmatprep.subr.mxu1 %v1897_v60 }
  0x30   :  { %1601 = vmatpush3.bf16.msra.mxu0 %v1848_v43  ;;  %1707 = vmatpush3.msra.mxu1 %v2149_v1 }
  0x31   :  { %1602 = vmatprep.subr.bf16.mxu0 %v1849_v46  ;;  %1708 = vmatprep.subr.mxu1 %v1897_v60 }
  0x32   :  { %1709 = vmatpush3.msra.mxu1 %v2156_v2 }
  0x33   :  { %1710 = vmatprep.subr.mxu1 %v1897_v60 }
  0x34   :  { %1603 = vmatpush3.bf16.msra.mxu0 %v1854_v49  ;;  %1711 = vmatpush3.msra.mxu1 %v2163_v3 }
  0x35   :  { %1604 = vmatprep.subr.bf16.mxu0 %v1857_v50  ;;  %1712 = vmatprep.subr.mxu1 %v1897_v60 }
  0x36   :  { %1713 = vmatpush3.msra.mxu1 %v2170_v4 }
  0x37   :  { %1714 = vmatprep.subr.mxu1 %v1897_v60 }
  0x38   :  { %1605 = vmatpush3.bf16.msra.mxu0 %v1858_v51  ;;  %1715 = vmatpush3.msra.mxu1 %v2177_v5 }
  0x39   :  { %1606 = vmatprep.subr.bf16.mxu0 %v1859_v53  ;;  %1716 = vmatprep.subr.mxu1 %v1897_v60 }
  0x3a   :  { %1717 = vmatpush3.msra.mxu1 %v2184_v6 }
  0x3b   :  { %1718 = vmatprep.subr.mxu1 %v1897_v60 }
  0x3c   :  { %1607 = vmatpush3.bf16.msra.mxu0 %v1860_v54  ;;  %1719 = vmatpush3.msra.mxu1 %v2191_v7 }
  0x3d   :  { %1608 = vmatprep.subr.bf16.mxu0 %v1861_v55  ;;  %1720 = vmatprep.subr.mxu1 %v1897_v60 }
  0x3e   :  { %1721 = vmatpush3.msra.mxu1 %v2198_v8 }
  0x3f   :  { %1722 = vmatprep.subr.mxu1 %v1897_v60 }
  0x40   :  { %1609 = vmatpush3.bf16.msra.mxu0 %v1862_v56  ;;  %1723 = vmatpush3.msra.mxu1 %v2205_v9 }
  0x41   :  { %1724 = vmatprep.subr.mxu1 %v1897_v60 }
  0x42   :  { %1725 = vmatpush3.msra.mxu1 %v2212_v10 }
  0x43   :  { %612 = vmatmul.mubr.bf16.vlgmr.msra.gmra.mxu0 %v1863_v57  ;;  %1726 = vmatprep.subr.mxu1 %v1897_v60 }
  0x44   :  { %619 = vmatprep.mubr.bf16.mxu0 %v1866_v58  ;;  %1727 = vmatpush3.msra.mxu1 %v2218_v11 }
  0x45   :  { %1728 = vmatprep.subr.mxu1 %v1897_v60 }
  0x46   :  { %1729 = vmatpush3.msra.mxu1 %v2224_v12 }
  0x47   :  { %1733 = vmatprep.subr.mxu1 %v1897_v60 }
  0x4b   :  { %620 = vmatmul.mubr.bf16.gmra.mxu0 %v1868_v59 }
  0xe3   :  { %v1554_v13 = vpop.f32.mrf.mxu0 }
  0xe4   :  { %v1582_v16 = vpop.f32.mrf.mxu1 }
  0xe5   :  { %v1555_v14 = vpop.f32.mrf.mxu0 }
  0xe6   :  { %v1583_v18 = vpop.f32.mrf.mxu1  ;;  %v1556_v28 = vadd.f32 %v1555_v14, %v1554_v13 }
  0xe7   :  { %v1557_v15 = vpop.f32.mrf.mxu0  ;;  %v1584_v29 = vadd.f32 %v1583_v18, %v1582_v16 }
  0xe8   :  { %v1585_v20 = vpop.f32.mrf.mxu1 }
  0xe9   :  { %v1558_v17 = vpop.f32.mrf.mxu0  ;;  %v565_v36 = vadd.f32 %v1584_v29, %v1556_v28 }
  0xea   :  { %v1586_v22 = vpop.f32.mrf.mxu1  ;;  %v1559_v31 = vadd.f32 %v1558_v17, %v1557_v15 }
  0xeb   :  { %v1560_v19 = vpop.f32.mrf.mxu0  ;;  %v1587_v32 = vadd.f32 %v1586_v22, %v1585_v20 }
  0xec   :  { %v1588_v24 = vpop.f32.mrf.mxu1 }
  0xed   :  { %v1561_v21 = vpop.f32.mrf.mxu0  ;;  %v568_v38 = vadd.f32 %v1587_v32, %v1559_v31 }
  0xee   :  { %v1589_v26 = vpop.f32.mrf.mxu1  ;;  %v1562_v43 = vadd.f32 %v1561_v21, %v1560_v19 }
  0xef   :  { %v1563_v23 = vpop.f32.mrf.mxu0  ;;  %v1590_v44 = vadd.f32 %v1589_v26, %v1588_v24 }
  0xf0   :  { %v1591_v33 = vpop.f32.mrf.mxu1 }
  0xf1   :  { %v1564_v25 = vpop.f32.mrf.mxu0  ;;  %v573_v54 = vadd.f32 %v1590_v44, %v1562_v43 }
  0xf2   :  { %v1592_v39 = vpop.f32.mrf.mxu1  ;;  %v1565_v46 = vadd.f32 %v1564_v25, %v1563_v23 }
  0xf3   :  { %v1593_v47 = vadd.f32 %v1592_v39, %v1591_v33 }
  0xf5   :  { %v576_v57 = vadd.f32 %v1593_v47, %v1565_v46 }
 0x103   :  { %v1610_v27 = vpop.f32.mrf.mxu0 }
 0x105   :  { %v1611_v30 = vpop.f32.mrf.mxu0 }
 0x106   :  { %v1612_v34 = vadd.f32 %v1611_v30, %v1610_v27 }
 0x107   :  { %v1613_v35 = vpop.f32.mrf.mxu0 }
 0x108   :  { %v2232_v40 = vadd.f32 %v1612_v34, %v565_v36 }
 0x109   :  { %v1614_v37 = vpop.f32.mrf.mxu0 }
 0x10a   :  { %v1615_v41 = vadd.f32 %v1614_v37, %v1613_v35  ;;  %v642_v49 = vmul.f32 %v2232_v40, %v2232_v40 }
 0x10b   :  { %v1616_v42 = vpop.f32.mrf.mxu0 }
 0x10c   :  { %v2234_v45 = vadd.f32 %v1615_v41, %v568_v38 }
 0x10d   :  { %v1617_v48 = vpop.f32.mrf.mxu0 }
 0x10e   :  { %v628_v50 = vadd.f32 %v2234_v45, %v2232_v40  ;;  %v643_v51 = vmul.f32 %v2234_v45, %v2234_v45  ;;  %v1618_v52 = vadd.f32 %v1617_v48, %v1616_v42 }
 0x10f   :  { %v1619_v53 = vpop.f32.mrf.mxu0 }
 0x110   :  { %v629_v55 = vrot.slane %v628_v50, 4  ;;  %v644_v56 = vadd.f32 %v643_v51, %v642_v49  ;;  %v2242_v14 = vadd.f32 %v1618_v52, %v573_v54 }
 0x111   :  { %v1620_v58 = vpop.f32.mrf.mxu0 }
 0x112   :  { %v630_v59 = vadd.f32 %v629_v55, %v628_v50  ;;  %v645_v13 = vrot.slane %v644_v56, 4  ;;  %v1621_v15 = vadd.f32 %v1620_v58, %v1619_v53  ;;  %v651_v19 = vmul.f32 %v2242_v14, %v2242_v14  ;;  %v24_v55 = vld [vmem:[%s2447_s3] sm:$0x3] }
 0x114   :  { %v646_v16 = vadd.f32 %v645_v13, %v644_v56  ;;  %v2244_v17 = vadd.f32 %v1621_v15, %v576_v57  ;;  %v631_v18 = vrot.slane %v630_v59, 2  ;;  %v761_v56 = vadd.f32 1.0, %v24_v55  ;;  %v2263_v57 = vld [vmem:[%s2448_s5] sm:$0xff] }
 0x116   :  { %v635_v20 = vadd.f32 %v2244_v17, %v2242_v14  ;;  %v652_v21 = vmul.f32 %v2244_v17, %v2244_v17  ;;  %v647_v22 = vrot.slane %v646_v16, 2  ;;  %v632_v25 = vadd.f32 %v631_v18, %v630_v59  ;;  %v1870_v18 = vld [vmem:[%s2449_s2 + $0x38] sm:$0xff]  }
 0x118   :  { %v636_v23 = vrot.slane %v635_v20, 4  ;;  %v653_v24 = vadd.f32 %v652_v21, %v651_v19  ;;  %v648_v28 = vadd.f32 %v647_v22, %v646_v16  ;;  %v633_v31 = vrot.slane %v632_v25, 1  ;;  %v1869_v16 = vld [vmem:[%s2449_s2 + $0x78] sm:$0xff]   ;;  %v1873_v21 = vld [vmem:[%s2449_s2 + $0x30] sm:$0xff]  }
 0x119   :  { %1641 = vmatprep.subr.bf16.mxu0 %v1869_v16  ;;  %v1871_v19 = vld [vmem:[%s2449_s2 + $0xb8] sm:$0xff]  }
 0x11a   :  { %v637_v26 = vadd.f32 %v636_v23, %v635_v20  ;;  %v654_v27 = vrot.slane %v653_v24, 4  ;;  %v649_v34 = vrot.slane %v648_v28, 1  ;;  %v634_v37 = vadd.f32 %v633_v31, %v632_v25  ;;  %1642 = vmatpush3.bf16.msra.mxu0 %v1870_v18  ;;  %v1872_v20 = vld [vmem:[%s2449_s2 + $0x70] sm:$0xff]   ;;  %v1875_v23 = vld [vmem:[%s2449_s2 + $0x68] sm:$0xff]  }
 0x11b   :  { %1643 = vmatprep.subr.bf16.mxu0 %v1872_v20  ;;  %v1876_v25 = vld [vmem:[%s2449_s2 + $0x28] sm:$0xff]  }
 0x11c   :  { %v638_v29 = vrot.slane %v637_v26, 2  ;;  %v655_v30 = vadd.f32 %v654_v27, %v653_v24  ;;  %v650_v41 = vadd.f32 %v649_v34, %v648_v28  ;;  %v1878_v27 = vld [vmem:[%s2449_s2 + $0x60] sm:$0xff]   ;;  %v1877_v34 = vld [vmem:[%s2449_s2 + $0xa8] sm:$0xff]  }
 0x11d   :  { %v1879_v28 = vld [vmem:[%s2449_s2 + $0x20] sm:$0xff]  }
 0x11e   :  { %v639_v32 = vadd.f32 %v638_v29, %v637_v26  ;;  %v656_v33 = vrot.slane %v655_v30, 2  ;;  %1644 = vmatpush3.bf16.msra.mxu0 %v1873_v21  ;;  %v1881_v29 = vld [vmem:[%s2449_s2 + $0x58] sm:$0xff]  }
 0x11f   :  { %1645 = vmatprep.subr.bf16.mxu0 %v1875_v23 }
 0x120   :  { %v640_v35 = vrot.slane %v639_v32, 1  ;;  %v657_v36 = vadd.f32 %v656_v33, %v655_v30  ;;  %v1882_v30 = vld [vmem:[%s2449_s2 + $0x18] sm:$0xff]  }
 0x122   :  { %v641_v38 = vadd.f32 %v640_v35, %v639_v32  ;;  %v658_v39 = vrot.slane %v657_v36, 1  ;;  %1646 = vmatpush3.bf16.msra.mxu0 %v1876_v25  ;;  %v1874_v32 = vld [vmem:[%s2449_s2 + $0xb0] sm:$0xff]   ;;  %v1880_v35 = vld [vmem:[%s2449_s2 + $0xa0] sm:$0xff]  }
 0x123   :  { %1647 = vmatprep.subr.bf16.mxu0 %v1878_v27 }
 0x124   :  { %v659_v42 = vadd.f32 %v658_v39, %v657_v36  ;;  %v661_v43 = vsel %vm660_vm1, %v634_v37, %v641_v38  ;;  %v1883_v36 = vld [vmem:[%s2449_s2 + $0x98] sm:$0xff]   ;;  %v1884_v37 = vld [vmem:[%s2449_s2 + $0x50] sm:$0xff]  }
 0x125   :  { %v663_v44 = vsel %vm662_vm2, %v661_v43, %v650_v41  ;;  %v1885_v38 = vld [vmem:[%s2449_s2 + $0x10] sm:$0xff]   ;;  %v1887_v41 = vld [vmem:[%s2449_s2 + $0x48] sm:$0xff]  }
 0x126   :  { %v665_v46 = vsel %vm664_vm3, %v663_v44, %v659_v42  ;;  %1648 = vmatpush3.bf16.msra.mxu0 %v1879_v28  ;;  %v1886_v39 = vld [vmem:[%s2449_s2 + $0x90] sm:$0xff]   ;;  %v1888_v42 = vld [vmem:[%s2449_s2 + $0x8] sm:$0xff]   ;;  %v1890_v44 = vld [vmem:[%s2449_s2 + $0x40] sm:$0xff]  }
 0x127   :  { %1731 = vmatmul.mubr.f32.vlgmr.msra.gmra.mxu1 %v665_v46  ;;  %1649 = vmatprep.subr.bf16.mxu0 %v1881_v29  ;;  %v1889_v43 = vld [vmem:[%s2449_s2 + $0x88] sm:$0xff]   ;;  %v1891_v46 = vld [vmem:[%s2449_s2] sm:$0xff]  }
 0x128   :  { %1735 = vmatprep.mubr.msk.f32.mxu1 %vm1898_vm0, %v1897_v60  ;;  %1734 = vmatpush3.msra.mxu1 %v2263_v57 }
 0x129   :  { %1738 = vmatprep.subr.bf16.mxu1 %v1871_v19 }
 0x12a   :  { %1650 = vmatpush3.bf16.msra.mxu0 %v1882_v30 }
 0x12b   :  { %1651 = vmatprep.subr.bf16.mxu0 %v1884_v37 }
 0x12e   :  { %1652 = vmatpush3.bf16.msra.mxu0 %v1885_v38 }
 0x12f   :  { %1653 = vmatprep.subr.bf16.mxu0 %v1887_v41 }
 0x132   :  { %1654 = vmatpush3.bf16.msra.mxu0 %v1888_v42 }
 0x133   :  { %1655 = vmatprep.subr.bf16.mxu0 %v1890_v44 }
 0x136   :  { %1656 = vmatpush3.bf16.msra.mxu0 %v1891_v46 }
 0x137   :  { %1758 = vmatprep.subr.mxu0 %v1897_v60 }
 0x1e7   :  { %v748_v47 = vpop.f32.mrf.mxu1 }
 0x1e8   :  { %v752_v48 = vmul.f32 0.00390625, %v748_v47  ;;  %v1892_v47 = vld [vmem:[%s2449_s2 + $0x80] sm:$0xff]  }
 0x1e9   :  { %v1732_v49 = vpop.f32.mrf.mxu1 }
 0x1ea   :  { %v753_v50 = vmul.f32 %v752_v48, %v752_v48 }
 0x1ec   :  { %v755_v51 = vrot.slane %v753_v50, 6 }
 0x1ee   :  { %v757_v52 = vsub.f32 %v752_v48, %v755_v51 }
 0x1f0   :  { %v758_v53 = vmax.f32 %v757_v52, 0.0 }
 0x1f2   :  { %v759_v54 = vadd.f32 1e-05, %v758_v53 }
 0x1f4   :  { %1893 = vrsqrt.f32 %v759_v54 }
 0x201   :  { %v1894_v58 = vpop.eup %1893 }
 0x202   :  { %v763_v59 = vrot.slane %v1894_v58, 2 }
 0x204   :  { %v765_v13 = vmul.f32 %v763_v59, %v761_v56 }
 0x206   :  { %v766_v15 = vmul.f32 %v765_v13, %v752_v48  ;;  %v853_v48 = vlaneseq }
 0x208   :  { %768 = vrot.lane.b32.xlu0 %v766_v15, %s1899_s28  ;;  %v2342_v49 = vshrl.u32 %v853_v48, 7 }
 0x20a   :  { %v855_v50 = vsub.s32 0, %v2342_v49  ;;  %v884_v51 = vsub.s32 1, %v2342_v49  ;;  %v861_v52 = vsub.s32 2, %v2342_v49  ;;  %v890_v53 = vsub.s32 3, %v2342_v49 }
 0x27a   :  { %v769_v22 = vpop.permute.xlu0 %768 }
 0x27b   :  { %v771_v24 = vsub.f32 %v24_v55, %v769_v22 }
 0x27d   :  { %v773_v26 = vrot.slane %v771_v24, 6 }
 0x27f   :  { %774 = vrot.lane.b32.xlu0 %v773_v26, %s1900_s19 }
 0x2f1   :  { %v775_v31 = vpop.permute.xlu0 %774 }
 0x2f2   :  { %v777_v33 = vsel %vm662_vm2, %v765_v13, %v775_v31 }
 0x2f3   :  { %1736 = vmatmul.mubr.msk.f32.vlgmr.msra.gmra.mxu1 %vm779_vm4, %v777_v33 }
 0x2f4   :  { %1739 = vmatpush3.bf16.msra.mxu1 %v1871_v19 }
 0x2f5   :  { %1740 = vmatprep.subr.bf16.mxu1 %v1874_v32 }
 0x2f8   :  { %1741 = vmatpush3.bf16.msra.mxu1 %v1874_v32 }
 0x2f9   :  { %1742 = vmatprep.subr.bf16.mxu1 %v1877_v34 }
 0x2fc   :  { %1743 = vmatpush3.bf16.msra.mxu1 %v1877_v34 }
 0x2fd   :  { %1744 = vmatprep.subr.bf16.mxu1 %v1880_v35 }
 0x300   :  { %1745 = vmatpush3.bf16.msra.mxu1 %v1880_v35 }
 0x301   :  { %1746 = vmatprep.subr.bf16.mxu1 %v1883_v36 }
 0x304   :  { %1747 = vmatpush3.bf16.msra.mxu1 %v1883_v36 }
 0x305   :  { %1748 = vmatprep.subr.bf16.mxu1 %v1886_v39 }
 0x308   :  { %1749 = vmatpush3.bf16.msra.mxu1 %v1886_v39 }
 0x309   :  { %1750 = vmatprep.subr.bf16.mxu1 %v1889_v43 }
 0x30c   :  { %1751 = vmatpush3.bf16.msra.mxu1 %v1889_v43 }
 0x30d   :  { %1752 = vmatprep.subr.bf16.mxu1 %v1892_v47 }
 0x310   :  { %1753 = vmatpush3.bf16.msra.mxu1 %v1892_v47 }
 0x311   :  { %1793 = vmatprep.subr.mxu1 %v1897_v60 }
 0x3b3   :  { %v849_v54 = vpop.f32.mrf.mxu1 }
 0x3b4   :  { %v856_v55 = vrot.slane %v849_v54, %v855_v50  ;;  %v885_v56 = vrot.slane %v849_v54, %v884_v51  ;;  %v862_v58 = vrot.slane %v849_v54, %v861_v52  ;;  %v891_v59 = vrot.slane %v849_v54, %v890_v53 }
 0x3b5   :  { %v1737_v13 = vpop.f32.mrf.mxu1 }
 0x3b6   :  { %v857_v15 = vmul.f32 %v856_v55, %v2232_v40  ;;  %v858_v16 = vmul.f32 %v856_v55, %v2234_v45  ;;  %v886_v18 = vmul.f32 %v885_v56, %v2242_v14  ;;  %v887_v19 = vmul.f32 %v885_v56, %v2244_v17 }
 0x3b8   :  { %v863_v20 = vadd.f32 %v862_v58, %v857_v15  ;;  %v864_v21 = vadd.f32 %v862_v58, %v858_v16  ;;  %v892_v22 = vadd.f32 %v891_v59, %v886_v18  ;;  %v893_v23 = vadd.f32 %v891_v59, %v887_v19 }
 0x3ba   :  { %v865_v24 = vmax.f32 %v863_v20, 0.0  ;;  %v866_v25 = vmax.f32 %v864_v21, 0.0  ;;  %v894_v26 = vmax.f32 %v892_v22, 0.0  ;;  %v895_v27 = vmax.f32 %v893_v23, 0.0 }
 0x3bc   :  { %v869_v28 = vrot.slane %v865_v24, 7  ;;  %v870_v29 = vrot.slane %v866_v25, 7  ;;  %v911_v30 = vpack.c.bf16 %v866_v25, %v865_v24  ;;  %v876_v40 = vrot.slane %v865_v24, 1 }
 0x3bd   :  { %v877_v45 = vrot.slane %v866_v25, 1  ;;  %v904_v31 = vrot.slane %v894_v26, 1  ;;  %v905_v14 = vrot.slane %v895_v27, 1  ;;  %v899_v33 = vrot.slane %v895_v27, 7 }
 0x3be   :  { %v871_v17 = vsel %vm660_vm1, %v869_v28, %v870_v29  ;;  %1140 = vmatprep.mubr.bf16.mxu0 %v911_v30  ;;  %v914_v39 = vpack.c.bf16 %v895_v27, %v894_v26  ;;  %v898_v41 = vrot.slane %v894_v26, 7 }
 0x3bf   :  { %v1525_v34 = vpack.c.bf16 %v871_v17, %v869_v28  ;;  %v878_v35 = vsel %vm875_vm6, %v876_v40, %v877_v45  ;;  %v906_v36 = vsel %vm875_vm6, %v904_v31, %v905_v14 }
 0x3c0   :  { %v1532_v37 = vpack.c.bf16 %v877_v45, %v878_v35  ;;  %v1535_v38 = vpack.c.bf16 %v905_v14, %v906_v36  ;;  %v900_v42 = vsel %vm660_vm1, %v898_v41, %v899_v33 }
 0x3c1   :  { %1526 = vmatmul.mubr.msk.bf16.vlgmr.msra.gmra.mxu0 %vm2362_vm8, %v1525_v34  ;;  %v1529_v43 = vpack.c.bf16 %v900_v42, %v898_v41 }
 0x3c2   :  { %1754 = vmatprep.mubr.msk.bf16.mxu1 %vm1531_vm9, %v1532_v37  ;;  %1148 = vmatprep.mubr.bf16.mxu0 %v914_v39 }
 0x3c3   :  { %1755 = vmatmul.mubr.msk.bf16.vlgmr.msra.gmra.mxu1 %vm1531_vm9, %v1535_v38  ;;  %1759 = vmatpush3.msra.mxu0 %v2121_v61 }
 0x3c4   :  { %1760 = vmatprep.subr.mxu0 %v1897_v60  ;;  %1794 = vmatpush3.msra.mxu1 %v2263_v57 }
 0x3c5   :  { %1761 = vmatpush3.msra.mxu0 %v2128_v62  ;;  %1795 = vmatprep.mubr.msk.f32.mxu1 %vm1898_vm0, %v1897_v60 }
 0x3c6   :  { %1762 = vmatprep.subr.mxu0 %v1897_v60 }
 0x3c7   :  { %1763 = vmatpush3.msra.mxu0 %v2135_v63 }
 0x3c8   :  { %1764 = vmatprep.subr.mxu0 %v1897_v60 }
 0x3c9   :  { %1530 = vmatmul.mubr.msk.bf16.gmra.mxu0 %vm2362_vm8, %v1529_v43 }
 0x3ca   :  { %1765 = vmatpush3.msra.mxu0 %v2142_v0  ;;  %1790 = vmatprep.mubr.msk.f32.mxu0 %vm1898_vm0, %v1897_v60 }
 0x3cb   :  { %1766 = vmatprep.subr.mxu0 %v1897_v60 }
 0x3cc   :  { %1767 = vmatpush3.msra.mxu0 %v2149_v1 }
 0x3cd   :  { %1768 = vmatprep.subr.mxu0 %v1897_v60 }
 0x3ce   :  { %1769 = vmatpush3.msra.mxu0 %v2156_v2 }
 0x3cf   :  { %1770 = vmatprep.subr.mxu0 %v1897_v60 }
 0x3d0   :  { %1771 = vmatpush3.msra.mxu0 %v2163_v3 }
 0x3d1   :  { %1772 = vmatprep.subr.mxu0 %v1897_v60 }
 0x3d2   :  { %1773 = vmatpush3.msra.mxu0 %v2170_v4 }
 0x3d3   :  { %1774 = vmatprep.subr.mxu0 %v1897_v60 }
 0x3d4   :  { %1775 = vmatpush3.msra.mxu0 %v2177_v5 }
 0x3d5   :  { %1776 = vmatprep.subr.mxu0 %v1897_v60 }
 0x3d6   :  { %1777 = vmatpush3.msra.mxu0 %v2184_v6 }
 0x3d7   :  { %1778 = vmatprep.subr.mxu0 %v1897_v60 }
 0x3d8   :  { %1779 = vmatpush3.msra.mxu0 %v2191_v7 }
 0x3d9   :  { %1780 = vmatprep.subr.mxu0 %v1897_v60 }
 0x3da   :  { %1781 = vmatpush3.msra.mxu0 %v2198_v8 }
 0x3db   :  { %1782 = vmatprep.subr.mxu0 %v1897_v60 }
 0x3dc   :  { %1783 = vmatpush3.msra.mxu0 %v2205_v9 }
 0x3dd   :  { %1784 = vmatprep.subr.mxu0 %v1897_v60 }
 0x3de   :  { %1785 = vmatpush3.msra.mxu0 %v2212_v10 }
 0x3df   :  { %1786 = vmatprep.subr.mxu0 %v1897_v60 }
 0x3e0   :  { %1787 = vmatpush3.msra.mxu0 %v2218_v11 }
 0x3e1   :  { %1788 = vmatprep.subr.mxu0 %v1897_v60 }
 0x3e2   :  { %1789 = vmatpush3.msra.mxu0 %v2224_v12 }
 0x481   :  { %v1657_v61 = vpop.f32.mrf.mxu0 }
 0x483   :  { %v1756_v62 = vpop.f32.mrf.mxu1  ;;  %v1658_v63 = vpop.f32.mrf.mxu0 }
 0x484   :  { %v1659_v0 = vadd.f32 %v1658_v63, %v1657_v61 }
 0x485   :  { %v1191_v1 = vpop.f32.mrf.mxu1  ;;  %v1660_v2 = vpop.f32.mrf.mxu0 }
 0x486   :  { %v2407_v5 = vadd.f32 %v1659_v0, %v1191_v1 }
 0x487   :  { %v1757_v3 = vpop.f32.mrf.mxu1  ;;  %v1661_v4 = vpop.f32.mrf.mxu0 }
 0x488   :  { %v1662_v6 = vadd.f32 %v1661_v4, %v1660_v2  ;;  %v1220_v60 = vmul.f32 %v2407_v5, %v2407_v5 }
 0x489   :  { %v1194_v7 = vpop.f32.mrf.mxu1  ;;  %v1663_v8 = vpop.f32.mrf.mxu0 }
 0x48a   :  { %v2409_v9 = vadd.f32 %v1662_v6, %v1194_v7 }
 0x48b   :  { %v1664_v10 = vpop.f32.mrf.mxu0 }
 0x48c   :  { %v1206_v11 = vadd.f32 %v2409_v9, %v2407_v5  ;;  %v1221_v12 = vmul.f32 %v2409_v9, %v2409_v9  ;;  %v1665_v57 = vadd.f32 %v1664_v10, %v1663_v8 }
 0x48d   :  { %v1666_v44 = vpop.f32.mrf.mxu0 }
 0x48e   :  { %v1207_v46 = vrot.slane %v1206_v11, 4  ;;  %v1222_v47 = vadd.f32 %v1221_v12, %v1220_v60  ;;  %v1200_v56 = vadd.f32 %v1756_v62, %v1665_v57 }
 0x48f   :  { %v1667_v48 = vpop.f32.mrf.mxu0 }
 0x490   :  { %v1208_v54 = vadd.f32 %v1207_v46, %v1206_v11  ;;  %v1223_v55 = vrot.slane %v1222_v47, 4  ;;  %v1668_v58 = vadd.f32 %v1667_v48, %v1666_v44  ;;  %v1229_v16 = vmul.f32 %v1200_v56, %v1200_v56 }
 0x492   :  { %v1224_v59 = vadd.f32 %v1223_v55, %v1222_v47  ;;  %v1203_v13 = vadd.f32 %v1757_v3, %v1668_v58  ;;  %v1209_v15 = vrot.slane %v1208_v54, 2 }
 0x494   :  { %v1213_v18 = vadd.f32 %v1203_v13, %v1200_v56  ;;  %v1230_v19 = vmul.f32 %v1203_v13, %v1203_v13  ;;  %v1225_v20 = vrot.slane %v1224_v59, 2  ;;  %v1210_v23 = vadd.f32 %v1209_v15, %v1208_v54 }
 0x496   :  { %v1214_v21 = vrot.slane %v1213_v18, 4  ;;  %v1231_v22 = vadd.f32 %v1230_v19, %v1229_v16  ;;  %v1226_v26 = vadd.f32 %v1225_v20, %v1224_v59  ;;  %v1211_v29 = vrot.slane %v1210_v23, 1 }
 0x498   :  { %v1215_v24 = vadd.f32 %v1214_v21, %v1213_v18  ;;  %v1232_v25 = vrot.slane %v1231_v22, 4  ;;  %v1227_v45 = vrot.slane %v1226_v26, 1  ;;  %v1212_v17 = vadd.f32 %v1211_v29, %v1210_v23 }
 0x49a   :  { %v1216_v27 = vrot.slane %v1215_v24, 2  ;;  %v1233_v28 = vadd.f32 %v1232_v25, %v1231_v22  ;;  %v1228_v34 = vadd.f32 %v1227_v45, %v1226_v26 }
 0x49c   :  { %v1217_v30 = vadd.f32 %v1216_v27, %v1215_v24  ;;  %v1234_v40 = vrot.slane %v1233_v28, 2 }
 0x49e   :  { %v1218_v31 = vrot.slane %v1217_v30, 1  ;;  %v1235_v14 = vadd.f32 %v1234_v40, %v1233_v28 }
 0x4a0   :  { %v1219_v32 = vadd.f32 %v1218_v31, %v1217_v30  ;;  %v1236_v33 = vrot.slane %v1235_v14, 1 }
 0x4a2   :  { %v1237_v35 = vadd.f32 %v1236_v33, %v1235_v14  ;;  %v1238_v36 = vsel %vm660_vm1, %v1212_v17, %v1219_v32 }
 0x4a3   :  { %v1239_v37 = vsel %vm662_vm2, %v1238_v36, %v1228_v34 }
 0x4a4   :  { %v1240_v38 = vsel %vm664_vm3, %v1239_v37, %v1237_v35 }
 0x4a5   :  { %1791 = vmatmul.mubr.f32.vlgmr.msra.gmra.mxu0 %v1240_v38 }
 0x565   :  { %v1307_v39 = vpop.f32.mrf.mxu0 }
 0x566   :  { %v1311_v41 = vmul.f32 0.00390625, %v1307_v39 }
 0x567   :  { %v1792_v42 = vpop.f32.mrf.mxu0 }
 0x568   :  { %v1312_v43 = vmul.f32 %v1311_v41, %v1311_v41  ;;  %v1320_v2 = vsub.f32 0.0, %v1311_v41 }
 0x56a   :  { %v1314_v61 = vrot.slane %v1312_v43, 6 }
 0x56c   :  { %v1316_v62 = vsub.f32 %v1311_v41, %v1314_v61 }
 0x56e   :  { %v1317_v63 = vmax.f32 %v1316_v62, 0.0 }
 0x570   :  { %v1318_v0 = vadd.f32 1e-05, %v1317_v63 }
 0x572   :  { %1895 = vrsqrt.f32 %v1318_v0 }
 0x57f   :  { %v1896_v1 = vpop.eup %1895 }
 0x580   :  { %v1322_v3 = vrot.slane %v1896_v1, 2 }
 0x582   :  { %v1324_v4 = vmul.f32 %v1322_v3, %v1320_v2 }
 0x584   :  { %v1326_v6 = vrot.slane %v1324_v4, 6 }
 0x586   :  { %v1328_v7 = vsel %vm662_vm2, %v1322_v3, %v1326_v6 }
 0x587   :  { %1796 = vmatmul.mubr.msk.f32.vlgmr.msra.gmra.mxu1 %vm779_vm4, %v1328_v7 }
 0x647   :  { %v1398_v8 = vpop.f32.mrf.mxu1 }
 0x648   :  { %v1405_v10 = vrot.slane %v1398_v8, %v855_v50  ;;  %v1419_v60 = vrot.slane %v1398_v8, %v884_v51  ;;  %v1411_v11 = vrot.slane %v1398_v8, %v861_v52  ;;  %v1425_v12 = vrot.slane %v1398_v8, %v890_v53 }
 0x649   :  { %v1797_v57 = vpop.f32.mrf.mxu1 }
 0x64a   :  { %v1406_v44 = vmul.f32 %v1405_v10, %v2407_v5  ;;  %v1407_v46 = vmul.f32 %v1405_v10, %v2409_v9  ;;  %v1420_v47 = vmul.f32 %v1419_v60, %v1200_v56  ;;  %v1421_v48 = vmul.f32 %v1419_v60, %v1203_v13 }
 0x64c   :  { %v1412_v54 = vadd.f32 %v1411_v11, %v1406_v44  ;;  %v1413_v55 = vadd.f32 %v1411_v11, %v1407_v46  ;;  %v1426_v58 = vadd.f32 %v1425_v12, %v1420_v47  ;;  %v1427_v50 = vadd.f32 %v1425_v12, %v1421_v48 }
 0x64e   :  { %v1414_v59 = vmax.f32 %v1412_v54, 0.0  ;;  %v1415_v15 = vmax.f32 %v1413_v55, 0.0  ;;  %v1428_v51 = vmax.f32 %v1426_v58, 0.0  ;;  %v1429_v16 = vmax.f32 %v1427_v50, 0.0 }
 0x650   :  { %1430 = vst [vmem:[%s2450_s6] sm:$0xff] %v1414_v59  ;;  %1431 = vst [vmem:[%s2450_s6 + $0x8] sm:$0xff] %v1415_v15 }
 0x651   :  { %1432 = vst [vmem:[%s2450_s6 + $0x10] sm:$0xff] %v1428_v51  ;;  %1433 = vst [vmem:[%s2450_s6 + $0x18] sm:$0xff] %v1429_v16 }

</bundles_post_ra>
